<compile_context>
chip_gen: v6e
topology: v6e:2x2x1
jax: 0.10.0
libtpu: 0.0.40
codegen_flags: <defaults>
</compile_context>

<pallas_src>
import functools

import jax
import jax.numpy as jnp
from jax.experimental import pallas as pl
from jax.experimental.pallas import tpu as pltpu

_IN, _H1, _H2, _OUT = 32, 16, 8, 2
_PACK = 16                       # samples packed per lane-row (16 * 32 = 512 lanes)
_TILE_B = 32768                  # default batch rows per grid step (multiple of 128)


def _round_up(n, m):
    return ((n + m - 1) // m) * m


def _block_diag(w, n):
    """[k, m] -> [n*k, n*m] block-diagonal matrix with n copies of w."""
    k, m = w.shape
    eye = jnp.eye(n, dtype=w.dtype)
    return (eye[:, None, :, None] * w[None, :, None, :]).reshape(n * k, n * m)


def _etguard_packed_kernel(x_ref, w1_ref, b1_ref, w2_ref, b2_ref, w3_ref,
                           b3_ref, out_ref):
    """Fused 3-layer MLP on one lane-packed batch tile.

    x_ref:   [rows, 512]   (rows = tile/16; 16 samples x 32 features per row)
    w1_ref:  [512, 256]    b1_ref: [1, 256]   (biases always f32)
    w2_ref:  [256, 128]    b2_ref: [1, 128]
    w3_ref:  [128, 32]     b3_ref: [1, 32]
    out_ref: [rows, 32]    f32  (16 samples x 2 logits per row, lane-packed)
    """
    x = x_ref[...]

    # layer 1: Linear(32 -> 16) x16 block-diag + ReLU, f32 accumulation on MXU.
    h1 = jnp.dot(x, w1_ref[...], preferred_element_type=jnp.float32)
    h1 = jnp.maximum(h1 + b1_ref[...], 0.0)
    # No-op in the f32 path; in the bf16 path (K=256) it reduces the MXU pass
    # count of the next matmul (guarded cast per review).
    h1 = h1.astype(w2_ref.dtype)

    # layer 2: Linear(16 -> 8) x16 block-diag + ReLU.
    h2 = jnp.dot(h1, w2_ref[...], preferred_element_type=jnp.float32)
    h2 = jnp.maximum(h2 + b2_ref[...], 0.0)
    h2 = h2.astype(w3_ref.dtype)

    # layer 3: Linear(8 -> 2) x16 block-diag; lane-packed [rows, 32] store.
    y = jnp.dot(h2, w3_ref[...], preferred_element_type=jnp.float32)
    out_ref[...] = (y + b3_ref[...]).astype(out_ref.dtype)


@functools.partial(jax.jit, static_argnames=("compute_dtype", "tile_b"))
def etguard_forward(x, params, *, compute_dtype=jnp.bfloat16, tile_b=_TILE_B):
    """x: [B, 32] float32 -> logits [B, 2] float32."""
    w1, b1, w2, b2, w3, b3 = params
    B = x.shape[0]

    # ---- tile / padding bookkeeping --------------------------------------
    # tile is a multiple of 128 (=> tile/PACK is a multiple of 8 sublanes and
    # tile is a multiple of the pack factor).  Force >= 2 grid steps whenever
    # possible so v7x can shard steps across both TensorCores; balance step
    # count for huge B so padding waste stays small.
    steps = max(2, pl.cdiv(B, tile_b))
    tile = min(tile_b, _round_up(pl.cdiv(B, steps), 128))
    b_pad = _round_up(B, tile)
    if b_pad != B:
        x = jnp.pad(x, ((0, b_pad - B), (0, 0)))
    grid = (b_pad // tile,)
    rows = tile // _PACK                       # packed rows per grid step

    # ---- lane-packing (free, row-major contiguous reshape) ---------------
    x_packed = x.reshape(b_pad // _PACK, _PACK * _IN).astype(compute_dtype)

    # Block-diagonal replicated weights (built once per call, <1 MiB, kept
    # VMEM-resident across all grid steps via constant index maps).  Weights
    # are cast to the compute dtype so MXU inputs stay uniform; biases and the
    # accumulation stay f32.
    w1b = _block_diag(w1, _PACK).astype(compute_dtype)    # [512, 256]
    w2b = _block_diag(w2, _PACK).astype(compute_dtype)    # [256, 128]
    w3b = _block_diag(w3, _PACK).astype(compute_dtype)    # [128, 32]
    b1t = jnp.tile(b1.astype(jnp.float32), (1, _PACK))    # [1, 256]
    b2t = jnp.tile(b2.astype(jnp.float32), (1, _PACK))    # [1, 128]
    b3t = jnp.tile(b3.astype(jnp.float32), (1, _PACK))    # [1, 32]

    def resident(a):
        # Whole-array block, constant index map: DMA'd once, stays in VMEM.
        return pl.BlockSpec(a.shape, lambda i: (0, 0))

    in_specs = [
        # x: streamed + double-buffered per grid step, fully lane-dense.
        pl.BlockSpec((rows, _PACK * _IN), lambda i: (i, 0)),
        resident(w1b), resident(b1t),
        resident(w2b), resident(b2t),
        resident(w3b), resident(b3t),
    ]
    # Lane-packed output block: reshapes (not transposes) to [B, 2] for free.
    out_spec = pl.BlockSpec((rows, _PACK * _OUT), lambda i: (i, 0))

    itemsize = jnp.dtype(compute_dtype).itemsize
    weight_bytes = (w1b.size + w2b.size + w3b.size) * itemsize + \
                   (b1t.size + b2t.size + b3t.size) * 4
    n_rows_total = b_pad // _PACK
    cost = pl.CostEstimate(
        flops=2 * n_rows_total * (_PACK * _IN * _PACK * _H1
                                  + _PACK * _H1 * _PACK * _H2
                                  + _PACK * _H2 * _PACK * _OUT),
        transcendentals=0,
        bytes_accessed=(b_pad * _IN * itemsize + b_pad * _OUT * 4
                        + weight_bytes),
    )

    out_packed = pl.pallas_call(
        _etguard_packed_kernel,
        out_shape=jax.ShapeDtypeStruct((n_rows_total, _PACK * _OUT),
                                       jnp.float32),
        grid=grid,
        in_specs=in_specs,
        out_specs=out_spec,
        compiler_params=pltpu.CompilerParams(
            dimension_semantics=("parallel",),
            vmem_limit_bytes=48 * 1024 * 1024,
        ),
        cost_estimate=cost,
    )(x_packed, w1b, b1t, w2b, b2t, w3b, b3t)
    # TODO(synk): optionally add pipeline_mode=pl.Buffered(3) to the x spec if
    # xprof still shows exposed input DMA (cheap: dense x block is 2-4 MiB).

    # Packed [b_pad/16, 32] -> [b_pad, 2] is a free row-major reshape; slice
    # off the padded rows (tiny copy, no transpose, no extra HBM pass).
    return out_packed.reshape(b_pad, _OUT)[:B]


def init_params(key):
    """Deterministic parameter init matching nn.Linear fan-in bounds.

    Weights are stored [in, out] (transposed relative to torch's [out, in])
    so the kernel computes x @ W without a transpose.
    """
    dims = [(_IN, _H1), (_H1, _H2), (_H2, _OUT)]
    params = []
    for fan_in, fan_out in dims:
        kw, kb, key = jax.random.split(key, 3)
        bound = 1.0 / jnp.sqrt(fan_in)
        w = jax.random.uniform(kw, (fan_in, fan_out), jnp.float32, -bound, bound)
        b = jax.random.uniform(kb, (1, fan_out), jnp.float32, -bound, bound)
        params += [w, b]
    return tuple(params)


def reference_forward(x, params):
    """Plain-JAX reference (full-precision matmuls) for correctness checks."""
    w1, b1, w2, b2, w3, b3 = params
    hp = jax.lax.Precision.HIGHEST
    h1 = jnp.maximum(jnp.dot(x, w1, precision=hp) + b1, 0.0)
    h2 = jnp.maximum(jnp.dot(h1, w2, precision=hp) + b2, 0.0)
    return jnp.dot(h2, w3, precision=hp) + b3


if __name__ == "__main__":
    key = jax.random.PRNGKey(0)
    kx, kp = jax.random.split(key)
    params = init_params(kp)

    # Case 1: module batch_size=128, default bf16 x/weight streaming.
    B = 128
    x = jax.random.normal(kx, (B, _IN), jnp.float32)
    ref = reference_forward(x, params)
    out = jax.block_until_ready(etguard_forward(x, params))
    assert out.shape == (B, _OUT)
    assert jnp.allclose(out, ref, atol=5e-2, rtol=5e-2), "bf16 mismatch vs reference"

    # Case 2: f32 path (tight tolerance), same batch.
    out_f32 = jax.block_until_ready(
        etguard_forward(x, params, compute_dtype=jnp.float32))
    assert out_f32.shape == (B, _OUT)
    assert jnp.allclose(out_f32, ref, atol=1e-3, rtol=1e-3), "f32 mismatch vs reference"

    # Case 3: ragged batch + multi-step grid (tile_b=128 -> tile=128, 3 steps;
    # exercises padding, lane-packing, weight residency, pipelined x stream).
    B2 = 300
    x2 = jax.random.normal(jax.random.PRNGKey(1), (B2, _IN), jnp.float32)
    ref2 = reference_forward(x2, params)
    out2 = jax.block_until_ready(
        etguard_forward(x2, params, compute_dtype=jnp.float32, tile_b=128))
    assert out2.shape == (B2, _OUT)
    assert jnp.allclose(out2, ref2, atol=1e-3, rtol=1e-3), "ragged-batch mismatch"

    print("KERNEL_OK")
</pallas_src>

<mosaic_0001>
module attributes {stable_mosaic.version = 11 : i64} {
  func.func @_etguard_packed_kernel(%arg0: i32, %arg1: memref<8x512xbf16, #tpu.memory_space<vmem>>, %arg2: memref<512x256xbf16, #tpu.memory_space<vmem>>, %arg3: memref<1x256xf32, #tpu.memory_space<vmem>>, %arg4: memref<256x128xbf16, #tpu.memory_space<vmem>>, %arg5: memref<1x128xf32, #tpu.memory_space<vmem>>, %arg6: memref<128x32xbf16, #tpu.memory_space<vmem>>, %arg7: memref<1x32xf32, #tpu.memory_space<vmem>>, %arg8: memref<8x32xf32, #tpu.memory_space<vmem>>) attributes {dimension_semantics = [#tpu.dimension_semantics<parallel>], iteration_bounds = array<i64: 1>, scalar_prefetch = 0 : i64, scratch_operands = 0 : i64, tpu.core_type = #tpu.core_type<tc>, window_params = [{transform_indices = @transform_0, window_bounds = array<i64: 8, 512>}, {pipeline_mode = #tpu.pipeline_mode<synchronous>, transform_indices = @transform_1, window_bounds = array<i64: 512, 256>}, {pipeline_mode = #tpu.pipeline_mode<synchronous>, transform_indices = @transform_2, window_bounds = array<i64: 1, 256>}, {pipeline_mode = #tpu.pipeline_mode<synchronous>, transform_indices = @transform_3, window_bounds = array<i64: 256, 128>}, {pipeline_mode = #tpu.pipeline_mode<synchronous>, transform_indices = @transform_4, window_bounds = array<i64: 1, 128>}, {pipeline_mode = #tpu.pipeline_mode<synchronous>, transform_indices = @transform_5, window_bounds = array<i64: 128, 32>}, {pipeline_mode = #tpu.pipeline_mode<synchronous>, transform_indices = @transform_6, window_bounds = array<i64: 1, 32>}, {transform_indices = @transform_7, window_bounds = array<i64: 8, 32>}]} {
    %c0 = arith.constant 0 : index
    %c0_0 = arith.constant 0 : index
    %0 = vector.load %arg1[%c0, %c0_0] : memref<8x512xbf16, #tpu.memory_space<vmem>>, vector<8x512xbf16>
    %c0_1 = arith.constant 0 : index
    %c0_2 = arith.constant 0 : index
    %1 = vector.load %arg2[%c0_1, %c0_2] : memref<512x256xbf16, #tpu.memory_space<vmem>>, vector<512x256xbf16>
    %cst = arith.constant dense<0.000000e+00> : vector<8x256xf32>
    %2 = tpu.matmul %0, %1, %cst {dimension_numbers = #tpu.dot_dimension_numbers<[1], [0], [0], [1], [0, 0, 1, 1], [], []>} : vector<8x512xbf16>, vector<512x256xbf16>, vector<8x256xf32> -> vector<8x256xf32>
    %c0_3 = arith.constant 0 : index
    %c0_4 = arith.constant 0 : index
    %3 = vector.load %arg3[%c0_3, %c0_4] : memref<1x256xf32, #tpu.memory_space<vmem>>, vector<1x256xf32>
    %4 = vector.broadcast %3 : vector<1x256xf32> to vector<8x256xf32>
    %5 = arith.addf %2, %4 : vector<8x256xf32>
    %cst_5 = arith.constant 0.000000e+00 : f32
    %6 = vector.broadcast %cst_5 : f32 to vector<8x256xf32>
    %7 = arith.maximumf %5, %6 : vector<8x256xf32>
    %8 = arith.truncf %7 : vector<8x256xf32> to vector<8x256xbf16>
    %c0_6 = arith.constant 0 : index
    %c0_7 = arith.constant 0 : index
    %9 = vector.load %arg4[%c0_6, %c0_7] : memref<256x128xbf16, #tpu.memory_space<vmem>>, vector<256x128xbf16>
    %cst_8 = arith.constant dense<0.000000e+00> : vector<8x128xf32>
    %10 = tpu.matmul %8, %9, %cst_8 {dimension_numbers = #tpu.dot_dimension_numbers<[1], [0], [0], [1], [0, 0, 1, 1], [], []>} : vector<8x256xbf16>, vector<256x128xbf16>, vector<8x128xf32> -> vector<8x128xf32>
    %c0_9 = arith.constant 0 : index
    %c0_10 = arith.constant 0 : index
    %11 = vector.load %arg5[%c0_9, %c0_10] : memref<1x128xf32, #tpu.memory_space<vmem>>, vector<1x128xf32>
    %12 = vector.broadcast %11 : vector<1x128xf32> to vector<8x128xf32>
    %13 = arith.addf %10, %12 : vector<8x128xf32>
    %cst_11 = arith.constant 0.000000e+00 : f32
    %14 = vector.broadcast %cst_11 : f32 to vector<8x128xf32>
    %15 = arith.maximumf %13, %14 : vector<8x128xf32>
    %16 = arith.truncf %15 : vector<8x128xf32> to vector<8x128xbf16>
    %c0_12 = arith.constant 0 : index
    %c0_13 = arith.constant 0 : index
    %17 = vector.load %arg6[%c0_12, %c0_13] : memref<128x32xbf16, #tpu.memory_space<vmem>>, vector<128x32xbf16>
    %cst_14 = arith.constant dense<0.000000e+00> : vector<8x32xf32>
    %18 = tpu.matmul %16, %17, %cst_14 {dimension_numbers = #tpu.dot_dimension_numbers<[1], [0], [0], [1], [0, 0, 1, 1], [], []>} : vector<8x128xbf16>, vector<128x32xbf16>, vector<8x32xf32> -> vector<8x32xf32>
    %c0_15 = arith.constant 0 : index
    %c0_16 = arith.constant 0 : index
    %19 = vector.load %arg7[%c0_15, %c0_16] : memref<1x32xf32, #tpu.memory_space<vmem>>, vector<1x32xf32>
    %20 = vector.broadcast %19 : vector<1x32xf32> to vector<8x32xf32>
    %21 = arith.addf %18, %20 : vector<8x32xf32>
    %c0_17 = arith.constant 0 : index
    %c0_18 = arith.constant 0 : index
    %22 = vector.load %arg8[%c0_17, %c0_18] : memref<8x32xf32, #tpu.memory_space<vmem>>, vector<8x32xf32>
    tpu.vector_store %arg8[%c0_17, %c0_18], %21 {strides = array<i32>} : memref<8x32xf32, #tpu.memory_space<vmem>>, vector<8x32xf32>,
    return
  }
  func.func @transform_0(%arg0: i32) -> (i32, i32) {
    %c0_i32 = arith.constant 0 : i32
    %c0_i32_0 = arith.constant 0 : i32
    return %arg0, %c0_i32 : i32, i32
  }
  func.func @transform_1(%arg0: i32) -> (i32, i32) {
    %c0_i32 = arith.constant 0 : i32
    %c0_i32_0 = arith.constant 0 : i32
    %c0_i32_1 = arith.constant 0 : i32
    return %c0_i32, %c0_i32_0 : i32, i32
  }
  func.func @transform_2(%arg0: i32) -> (i32, i32) {
    %c0_i32 = arith.constant 0 : i32
    %c0_i32_0 = arith.constant 0 : i32
    %c0_i32_1 = arith.constant 0 : i32
    return %c0_i32, %c0_i32_0 : i32, i32
  }
  func.func @transform_3(%arg0: i32) -> (i32, i32) {
    %c0_i32 = arith.constant 0 : i32
    %c0_i32_0 = arith.constant 0 : i32
    %c0_i32_1 = arith.constant 0 : i32
    return %c0_i32, %c0_i32_0 : i32, i32
  }
  func.func @transform_4(%arg0: i32) -> (i32, i32) {
    %c0_i32 = arith.constant 0 : i32
    %c0_i32_0 = arith.constant 0 : i32
    %c0_i32_1 = arith.constant 0 : i32
    return %c0_i32, %c0_i32_0 : i32, i32
  }
  func.func @transform_5(%arg0: i32) -> (i32, i32) {
    %c0_i32 = arith.constant 0 : i32
    %c0_i32_0 = arith.constant 0 : i32
    %c0_i32_1 = arith.constant 0 : i32
    return %c0_i32, %c0_i32_0 : i32, i32
  }
  func.func @transform_6(%arg0: i32) -> (i32, i32) {
    %c0_i32 = arith.constant 0 : i32
    %c0_i32_0 = arith.constant 0 : i32
    %c0_i32_1 = arith.constant 0 : i32
    return %c0_i32, %c0_i32_0 : i32, i32
  }
  func.func @transform_7(%arg0: i32) -> (i32, i32) {
    %c0_i32 = arith.constant 0 : i32
    %c0_i32_0 = arith.constant 0 : i32
    return %arg0, %c0_i32 : i32, i32
  }
}

</mosaic_0001>

<bundles_post_ra>
// kernel: etguard_forward.1
= control target key start
LH: loop header
LB: loop body
LE: loop exit
PB: predicated region body
PF: predicated region fallthrough
CT: control target
= control target key end

     0   :  { %vm1091_vm0 = vmmov 0   ;;  %vm813_vm1 = vcmask 261120   ;;  %s1414_s1 = inlined_call_operand.vmem [shape: bf16[512,256], index: 1, kind: input, shape index: {}]   ;;  %s1415_s0 = inlined_call_operand.vmem [shape: bf16[8,512], index: 0, kind: input, shape index: {}]   ;;  %s1416_s3 = inlined_call_operand.vmem [shape: bf16[256,128], index: 3, kind: input, shape index: {}]   ;;  %s1417_s5 = inlined_call_operand.vmem [shape: bf16[128,32], index: 5, kind: input, shape index: {}]   ;;  %s1418_s2 = inlined_call_operand.vmem [shape: f32[1,256], index: 2, kind: input, shape index: {}]   ;;  %s1419_s4 = inlined_call_operand.vmem [shape: f32[1,128], index: 4, kind: input, shape index: {}]   ;;  %s1420_s6 = inlined_call_operand.vmem [shape: f32[1,32], index: 6, kind: input, shape index: {}]   ;;  %s1421_s7 = inlined_call_operand.vmem [shape: f32[8,32], index: 7, kind: output, shape index: {}]  }
   0x1   :  { %v966_v0 = vld [vmem:[%s1414_s1 + $0x74] ss:$8 sps:$4 sm:$0xff]   ;;  %v970_v2 = vld [vmem:[%s1414_s1 + $0x70] ss:$8 sps:$4 sm:$0xff]   ;;  %v972_v4 = vld [vmem:[%s1414_s1 + $0x64] ss:$8 sps:$4 sm:$0xff]  }
   0x2   :  { %v968_v1 = vld [vmem:[%s1414_s1 + $0x174] ss:$8 sps:$4 sm:$0xff]   ;;  %439 = vmatprep.subr.bf16.mxu0 %v966_v0  ;;  %v971_v3 = vld [vmem:[%s1414_s1 + $0x170] ss:$8 sps:$4 sm:$0xff]   ;;  %v974_v5 = vld [vmem:[%s1414_s1 + $0x164] ss:$8 sps:$4 sm:$0xff]  }
   0x3   :  { %480 = vmatprep.subr.bf16.mxu1 %v968_v1  ;;  %440 = vmatpush1.bf16.msra.mxu0 %v970_v2  ;;  %v976_v6 = vld [vmem:[%s1414_s1 + $0x60] ss:$8 sps:$4 sm:$0xff]   ;;  %v978_v8 = vld [vmem:[%s1414_s1 + $0x54] ss:$8 sps:$4 sm:$0xff]   ;;  %v982_v10 = vld [vmem:[%s1414_s1 + $0x50] ss:$8 sps:$4 sm:$0xff]  }
   0x4   :  { %481 = vmatpush1.bf16.msra.mxu1 %v971_v3  ;;  %441 = vmatprep.subr.bf16.mxu0 %v972_v4  ;;  %v977_v7 = vld [vmem:[%s1414_s1 + $0x160] ss:$8 sps:$4 sm:$0xff]   ;;  %v980_v9 = vld [vmem:[%s1414_s1 + $0x154] ss:$8 sps:$4 sm:$0xff]   ;;  %v983_v11 = vld [vmem:[%s1414_s1 + $0x150] ss:$8 sps:$4 sm:$0xff]  }
   0x5   :  { %482 = vmatprep.subr.bf16.mxu1 %v974_v5  ;;  %v984_v12 = vld [vmem:[%s1414_s1 + $0x44] ss:$8 sps:$4 sm:$0xff]   ;;  %v988_v14 = vld [vmem:[%s1414_s1 + $0x40] ss:$8 sps:$4 sm:$0xff]   ;;  %v990_v16 = vld [vmem:[%s1414_s1 + $0x34] ss:$8 sps:$4 sm:$0xff]  }
   0x6   :  { %v986_v13 = vld [vmem:[%s1414_s1 + $0x144] ss:$8 sps:$4 sm:$0xff]   ;;  %v989_v15 = vld [vmem:[%s1414_s1 + $0x140] ss:$8 sps:$4 sm:$0xff]   ;;  %v992_v17 = vld [vmem:[%s1414_s1 + $0x134] ss:$8 sps:$4 sm:$0xff]  }
   0x7   :  { %442 = vmatpush1.bf16.msra.mxu0 %v976_v6  ;;  %v994_v18 = vld [vmem:[%s1414_s1 + $0x30] ss:$8 sps:$4 sm:$0xff]   ;;  %v996_v20 = vld [vmem:[%s1414_s1 + $0x24] ss:$8 sps:$4 sm:$0xff]   ;;  %v1000_v22 = vld [vmem:[%s1414_s1 + $0x20] ss:$8 sps:$4 sm:$0xff]  }
   0x8   :  { %483 = vmatpush1.bf16.msra.mxu1 %v977_v7  ;;  %443 = vmatprep.subr.bf16.mxu0 %v978_v8  ;;  %v995_v19 = vld [vmem:[%s1414_s1 + $0x130] ss:$8 sps:$4 sm:$0xff]   ;;  %v998_v21 = vld [vmem:[%s1414_s1 + $0x124] ss:$8 sps:$4 sm:$0xff]   ;;  %v1001_v23 = vld [vmem:[%s1414_s1 + $0x120] ss:$8 sps:$4 sm:$0xff]  }
   0x9   :  { %484 = vmatprep.subr.bf16.mxu1 %v980_v9  ;;  %v1002_v24 = vld [vmem:[%s1414_s1 + $0x14] ss:$8 sps:$4 sm:$0xff]   ;;  %v1006_v26 = vld [vmem:[%s1414_s1 + $0x10] ss:$8 sps:$4 sm:$0xff]   ;;  %v1008_v28 = vld [vmem:[%s1414_s1 + $0x4] ss:$8 sps:$4 sm:$0xff]  }
   0xa   :  { %v1004_v25 = vld [vmem:[%s1414_s1 + $0x114] ss:$8 sps:$4 sm:$0xff]   ;;  %v1007_v27 = vld [vmem:[%s1414_s1 + $0x110] ss:$8 sps:$4 sm:$0xff]   ;;  %v1010_v29 = vld [vmem:[%s1414_s1 + $0x104] ss:$8 sps:$4 sm:$0xff]  }
   0xb   :  { %444 = vmatpush1.bf16.msra.mxu0 %v982_v10  ;;  %v1012_v30 = vld [vmem:[%s1414_s1] ss:$8 sps:$4 sm:$0xff]   ;;  %v1014_v32 = vld [vmem:[%s1414_s1 + $0xf4] ss:$8 sps:$4 sm:$0xff]   ;;  %v1018_v34 = vld [vmem:[%s1414_s1 + $0xf0] ss:$8 sps:$4 sm:$0xff]  }
   0xc   :  { %485 = vmatpush1.bf16.msra.mxu1 %v983_v11  ;;  %445 = vmatprep.subr.bf16.mxu0 %v984_v12  ;;  %v1013_v31 = vld [vmem:[%s1414_s1 + $0x100] ss:$8 sps:$4 sm:$0xff]   ;;  %v1016_v33 = vld [vmem:[%s1414_s1 + $0x1f4] ss:$8 sps:$4 sm:$0xff]   ;;  %v1019_v35 = vld [vmem:[%s1414_s1 + $0x1f0] ss:$8 sps:$4 sm:$0xff]  }
   0xd   :  { %486 = vmatprep.subr.bf16.mxu1 %v986_v13  ;;  %v1020_v36 = vld [vmem:[%s1414_s1 + $0xe4] ss:$8 sps:$4 sm:$0xff]   ;;  %v1024_v38 = vld [vmem:[%s1414_s1 + $0xe0] ss:$8 sps:$4 sm:$0xff]   ;;  %v1026_v40 = vld [vmem:[%s1414_s1 + $0xd4] ss:$8 sps:$4 sm:$0xff]  }
   0xe   :  { %v1022_v37 = vld [vmem:[%s1414_s1 + $0x1e4] ss:$8 sps:$4 sm:$0xff]   ;;  %v1025_v39 = vld [vmem:[%s1414_s1 + $0x1e0] ss:$8 sps:$4 sm:$0xff]   ;;  %v1028_v41 = vld [vmem:[%s1414_s1 + $0x1d4] ss:$8 sps:$4 sm:$0xff]  }
   0xf   :  { %446 = vmatpush1.bf16.msra.mxu0 %v988_v14  ;;  %v1030_v42 = vld [vmem:[%s1414_s1 + $0xd0] ss:$8 sps:$4 sm:$0xff]   ;;  %v1032_v44 = vld [vmem:[%s1414_s1 + $0xc4] ss:$8 sps:$4 sm:$0xff]   ;;  %v1036_v46 = vld [vmem:[%s1414_s1 + $0xc0] ss:$8 sps:$4 sm:$0xff]  }
  0x10   :  { %487 = vmatpush1.bf16.msra.mxu1 %v989_v15  ;;  %447 = vmatprep.subr.bf16.mxu0 %v990_v16  ;;  %v1031_v43 = vld [vmem:[%s1414_s1 + $0x1d0] ss:$8 sps:$4 sm:$0xff]   ;;  %v1034_v45 = vld [vmem:[%s1414_s1 + $0x1c4] ss:$8 sps:$4 sm:$0xff]   ;;  %v1037_v47 = vld [vmem:[%s1414_s1 + $0x1c0] ss:$8 sps:$4 sm:$0xff]  }
  0x11   :  { %488 = vmatprep.subr.bf16.mxu1 %v992_v17  ;;  %v27_v48 = vld [vmem:[%s1415_s0] sm:$0xff]  ;;  %v28_v50 = vld [vmem:[%s1415_s0 + $0x8] sm:$0xff]  ;;  %v1038_v51 = vld [vmem:[%s1414_s1 + $0xb4] ss:$8 sps:$4 sm:$0xff]  }
  0x12   :  { %v820_v49 = vcombine.high %v27_v48, %v27_v48  ;;  %v822_v52 = vcombine.high %v28_v50, %v28_v50  ;;  %v1040_v53 = vld [vmem:[%s1414_s1 + $0x1b4] ss:$8 sps:$4 sm:$0xff]   ;;  %v1042_v54 = vld [vmem:[%s1414_s1 + $0xb0] ss:$8 sps:$4 sm:$0xff]   ;;  %v1044_v56 = vld [vmem:[%s1414_s1 + $0xa4] ss:$8 sps:$4 sm:$0xff]   ;;  %v819_v5 = vcombine.low %v27_v48, %v27_v48  ;;  %v821_v6 = vcombine.low %v28_v50, %v28_v50 }
  0x13   :  { %448 = vmatpush1.bf16.msra.mxu0 %v994_v18  ;;  %v1043_v55 = vld [vmem:[%s1414_s1 + $0x1b0] ss:$8 sps:$4 sm:$0xff]   ;;  %v1046_v57 = vld [vmem:[%s1414_s1 + $0x1a4] ss:$8 sps:$4 sm:$0xff]   ;;  %v1048_v58 = vld [vmem:[%s1414_s1 + $0xa0] ss:$8 sps:$4 sm:$0xff]  }
  0x14   :  { %489 = vmatpush1.bf16.msra.mxu1 %v995_v19  ;;  %449 = vmatprep.subr.bf16.mxu0 %v996_v20  ;;  %v1049_v59 = vld [vmem:[%s1414_s1 + $0x1a0] ss:$8 sps:$4 sm:$0xff]   ;;  %v1050_v60 = vld [vmem:[%s1414_s1 + $0x94] ss:$8 sps:$4 sm:$0xff]   ;;  %v1054_v62 = vld [vmem:[%s1414_s1 + $0x90] ss:$8 sps:$4 sm:$0xff]  }
  0x15   :  { %490 = vmatprep.subr.bf16.mxu1 %v998_v21  ;;  %471 = vmatprep.mubr.bf16.mxu0 %v820_v49  ;;  %v1052_v61 = vld [vmem:[%s1414_s1 + $0x194] ss:$8 sps:$4 sm:$0xff]   ;;  %v1055_v63 = vld [vmem:[%s1414_s1 + $0x190] ss:$8 sps:$4 sm:$0xff]   ;;  %v1056_v0 = vld [vmem:[%s1414_s1 + $0x84] ss:$8 sps:$4 sm:$0xff]  }
  0x16   :  { %512 = vmatprep.mubr.bf16.mxu1 %v822_v52  ;;  %v1058_v1 = vld [vmem:[%s1414_s1 + $0x184] ss:$8 sps:$4 sm:$0xff]   ;;  %v1060_v2 = vld [vmem:[%s1414_s1 + $0x80] ss:$8 sps:$4 sm:$0xff]   ;;  %v1066_v4 = vld [vmem:[%s1416_s3 + $0x78] sm:$0xff]  }
  0x17   :  { %450 = vmatpush1.bf16.msra.mxu0 %v1000_v22  ;;  %v1061_v3 = vld [vmem:[%s1414_s1 + $0x180] ss:$8 sps:$4 sm:$0xff]   ;;  %v1067_v7 = vld [vmem:[%s1416_s3 + $0x38] sm:$0xff]   ;;  %v1068_v8 = vld [vmem:[%s1416_s3 + $0x70] sm:$0xff]   ;;  %v1090_v22 = vmov 0.0  }
  0x18   :  { %491 = vmatpush1.bf16.msra.mxu1 %v1001_v23  ;;  %451 = vmatprep.subr.bf16.mxu0 %v1002_v24  ;;  %v1069_v9 = vld [vmem:[%s1416_s3 + $0x30] sm:$0xff]   ;;  %v1070_v10 = vld [vmem:[%s1416_s3 + $0x68] sm:$0xff]   ;;  %v1072_v12 = vld [vmem:[%s1416_s3 + $0x60] sm:$0xff]  }
  0x19   :  { %492 = vmatprep.subr.bf16.mxu1 %v1004_v25  ;;  %v1071_v11 = vld [vmem:[%s1416_s3 + $0x28] sm:$0xff]   ;;  %v1073_v13 = vld [vmem:[%s1416_s3 + $0x20] sm:$0xff]   ;;  %v1074_v14 = vld [vmem:[%s1416_s3 + $0x58] sm:$0xff]  }
  0x1a   :  { %v1075_v15 = vld [vmem:[%s1416_s3 + $0x18] sm:$0xff]   ;;  %v1076_v16 = vld [vmem:[%s1416_s3 + $0x50] sm:$0xff]   ;;  %v1078_v18 = vld [vmem:[%s1416_s3 + $0x48] sm:$0xff]  }
  0x1b   :  { %452 = vmatpush1.bf16.msra.mxu0 %v1006_v26  ;;  %v1077_v17 = vld [vmem:[%s1416_s3 + $0x10] sm:$0xff]   ;;  %v1079_v19 = vld [vmem:[%s1416_s3 + $0x8] sm:$0xff]   ;;  %v1080_v20 = vld [vmem:[%s1416_s3 + $0x40] sm:$0xff]  }
  0x1c   :  { %493 = vmatpush1.bf16.msra.mxu1 %v1007_v27  ;;  %453 = vmatprep.subr.bf16.mxu0 %v1008_v28  ;;  %v1081_v21 = vld [vmem:[%s1416_s3] sm:$0xff]   ;;  %v1082_v23 = vld [vmem:[%s1417_s5 + $0x38] sm:$0xff]   ;;  %v1083_v24 = vld [vmem:[%s1417_s5 + $0x30] sm:$0xff]   ;;  %v95_v28 = vlaneseq }
  0x1d   :  { %494 = vmatprep.subr.bf16.mxu1 %v1010_v29  ;;  %v1084_v25 = vld [vmem:[%s1417_s5 + $0x28] sm:$0xff]   ;;  %v1085_v26 = vld [vmem:[%s1417_s5 + $0x20] sm:$0xff]   ;;  %v1086_v27 = vld [vmem:[%s1417_s5 + $0x18] sm:$0xff]  }
  0x1e   :  { %v96_v29 = vshrl.u32 %v95_v28, 7  ;;  %v1088_v52 = vld [vmem:[%s1417_s5 + $0x8] sm:$0xff]  }
  0x1f   :  { %454 = vmatpush1.bf16.msra.mxu0 %v1012_v30 }
  0x20   :  { %495 = vmatpush1.bf16.msra.mxu1 %v1013_v31  ;;  %455 = vmatprep.subr.bf16.mxu0 %v1014_v32  ;;  %v97_v30 = vsub.s32 0, %v96_v29  ;;  %v93_v31 = vld [vmem:[%s1418_s2] sm:$0x3]  ;;  %v101_v32 = vsub.s32 1, %v96_v29 }
  0x21   :  { %496 = vmatprep.subr.bf16.mxu1 %v1016_v33 }
  0x22   :  { %v98_v33 = vrot.slane %v93_v31, %v97_v30 }
  0x23   :  { %456 = vmatpush2.bf16.msra.mxu0 %v1018_v34  ;;  %v102_v34 = vrot.slane %v93_v31, %v101_v32 }
  0x24   :  { %497 = vmatpush2.bf16.msra.mxu1 %v1019_v35  ;;  %457 = vmatprep.subr.bf16.mxu0 %v1020_v36 }
  0x25   :  { %498 = vmatprep.subr.bf16.mxu1 %v1022_v37 }
  0x27   :  { %458 = vmatpush2.bf16.msra.mxu0 %v1024_v38 }
  0x28   :  { %499 = vmatpush2.bf16.msra.mxu1 %v1025_v39  ;;  %459 = vmatprep.subr.bf16.mxu0 %v1026_v40 }
  0x29   :  { %500 = vmatprep.subr.bf16.mxu1 %v1028_v41 }
  0x2b   :  { %460 = vmatpush2.bf16.msra.mxu0 %v1030_v42 }
  0x2c   :  { %501 = vmatpush2.bf16.msra.mxu1 %v1031_v43  ;;  %461 = vmatprep.subr.bf16.mxu0 %v1032_v44 }
  0x2d   :  { %502 = vmatprep.subr.bf16.mxu1 %v1034_v45 }
  0x2f   :  { %462 = vmatpush2.bf16.msra.mxu0 %v1036_v46 }
  0x30   :  { %503 = vmatpush2.bf16.msra.mxu1 %v1037_v47  ;;  %463 = vmatprep.subr.bf16.mxu0 %v1038_v51  ;;  %v1087_v51 = vld [vmem:[%s1417_s5 + $0x10] sm:$0xff]  }
  0x31   :  { %504 = vmatprep.subr.bf16.mxu1 %v1040_v53  ;;  %v1089_v53 = vld [vmem:[%s1417_s5] sm:$0xff]  }
  0x33   :  { %464 = vmatpush2.bf16.msra.mxu0 %v1042_v54 }
  0x34   :  { %505 = vmatpush2.bf16.msra.mxu1 %v1043_v55  ;;  %465 = vmatprep.subr.bf16.mxu0 %v1044_v56  ;;  %v887_v55 = vld [vmem:[%s1419_s4] ss:$0 sm:$0xff] }
  0x35   :  { %506 = vmatprep.subr.bf16.mxu1 %v1046_v57 }
  0x37   :  { %466 = vmatpush2.bf16.msra.mxu0 %v1048_v58 }
  0x38   :  { %507 = vmatpush2.bf16.msra.mxu1 %v1049_v59  ;;  %467 = vmatprep.subr.bf16.mxu0 %v1050_v60 }
  0x39   :  { %508 = vmatprep.subr.bf16.mxu1 %v1052_v61 }
  0x3b   :  { %468 = vmatpush2.bf16.msra.mxu0 %v1054_v62 }
  0x3c   :  { %509 = vmatpush2.bf16.msra.mxu1 %v1055_v63  ;;  %469 = vmatprep.subr.bf16.mxu0 %v1056_v0  ;;  %v904_v63 = vld [vmem:[%s1420_s6] ss:$0 sm:$0xff] }
  0x3d   :  { %510 = vmatprep.subr.bf16.mxu1 %v1058_v1 }
  0x3f   :  { %470 = vmatpush2.bf16.msra.mxu0 %v1060_v2 }
  0x40   :  { %511 = vmatpush2.bf16.msra.mxu1 %v1061_v3  ;;  %913 = vmatprep.subr.bf16.mxu0 %v1066_v4 }
  0x41   :  { %944 = vmatprep.subr.bf16.mxu1 %v1090_v22 }
  0x42   :  { %472 = vmatmul.mubr.bf16.vlgmr.msra.gmra.mxu0 %v819_v5 }
  0x43   :  { %513 = vmatmul.mubr.bf16.vlgmr.msra.gmra.mxu1 %v821_v6  ;;  %914 = vmatpush3.bf16.msra.mxu0 %v1067_v7 }
  0x44   :  { %915 = vmatprep.subr.bf16.mxu0 %v1068_v8  ;;  %945 = vmatpush3.bf16.msra.mxu1 %v1082_v23 }
  0x45   :  { %946 = vmatprep.subr.bf16.mxu1 %v1090_v22  ;;  %960 = vmatprep.mubr.msk.bf16.mxu1 %vm1091_vm0, %v1090_v22 }
  0x47   :  { %916 = vmatpush3.bf16.msra.mxu0 %v1069_v9 }
  0x48   :  { %917 = vmatprep.subr.bf16.mxu0 %v1070_v10  ;;  %947 = vmatpush3.bf16.msra.mxu1 %v1083_v24 }
  0x49   :  { %948 = vmatprep.subr.bf16.mxu1 %v1090_v22 }
  0x4b   :  { %918 = vmatpush3.bf16.msra.mxu0 %v1071_v11 }
  0x4c   :  { %919 = vmatprep.subr.bf16.mxu0 %v1072_v12  ;;  %949 = vmatpush3.bf16.msra.mxu1 %v1084_v25 }
  0x4d   :  { %950 = vmatprep.subr.bf16.mxu1 %v1090_v22 }
  0x4f   :  { %920 = vmatpush3.bf16.msra.mxu0 %v1073_v13 }
  0x50   :  { %921 = vmatprep.subr.bf16.mxu0 %v1074_v14  ;;  %951 = vmatpush3.bf16.msra.mxu1 %v1085_v26 }
  0x51   :  { %952 = vmatprep.subr.bf16.mxu1 %v1090_v22 }
  0x53   :  { %922 = vmatpush3.bf16.msra.mxu0 %v1075_v15 }
  0x54   :  { %923 = vmatprep.subr.bf16.mxu0 %v1076_v16  ;;  %953 = vmatpush3.bf16.msra.mxu1 %v1086_v27 }
  0x55   :  { %954 = vmatprep.subr.bf16.mxu1 %v1090_v22 }
  0x57   :  { %924 = vmatpush3.bf16.msra.mxu0 %v1077_v17 }
  0x58   :  { %925 = vmatprep.subr.bf16.mxu0 %v1078_v18  ;;  %955 = vmatpush3.bf16.msra.mxu1 %v1087_v51 }
  0x59   :  { %956 = vmatprep.subr.bf16.mxu1 %v1090_v22 }
  0x5b   :  { %926 = vmatpush3.bf16.msra.mxu0 %v1079_v19 }
  0x5c   :  { %927 = vmatprep.subr.bf16.mxu0 %v1080_v20  ;;  %957 = vmatpush3.bf16.msra.mxu1 %v1088_v52 }
  0x5d   :  { %958 = vmatprep.subr.bf16.mxu1 %v1090_v22 }
  0x5f   :  { %928 = vmatpush3.bf16.msra.mxu0 %v1081_v21 }
  0x60   :  { %959 = vmatpush3.bf16.msra.mxu1 %v1089_v53 }
 0x102   :  { %v473_v35 = vpop.f32.mrf.mxu0 }
 0x103   :  { %v514_v36 = vpop.f32.mrf.mxu1  ;;  %v474_v37 = vadd.f32 %v473_v35, %v98_v33 }
 0x104   :  { %v475_v38 = vpop.f32.mrf.mxu0 }
 0x105   :  { %v516_v39 = vpop.f32.mrf.mxu1  ;;  %v515_v40 = vadd.f32 %v514_v36, %v474_v37  ;;  %v476_v41 = vadd.f32 %v475_v38, %v102_v34 }
 0x106   :  { %v477_v42 = vpop.f32.mrf.mxu0 }
 0x107   :  { %v518_v43 = vpop.f32.mrf.mxu1  ;;  %v517_v44 = vadd.f32 %v516_v39, %v476_v41  ;;  %v521_v45 = vmax.f32 %v515_v40, 0.0 }
 0x108   :  { %v478_v46 = vpop.f32.mrf.mxu0 }
 0x109   :  { %v519_v47 = vpop.f32.mrf.mxu1  ;;  %v522_v48 = vmax.f32 %v517_v44, 0.0  ;;  %v523_v50 = vpack.c.bf16 %v521_v45, %v521_v45 }
 0x10b   :  { %v524_v49 = vpack.c.bf16 %v522_v48, %v522_v48 }
 0x10d   :  { %692 = vmatprep.mubr.bf16.mxu0 %v524_v49 }
 0x10e   :  { %693 = vmatmul.mubr.bf16.vlgmr.msra.gmra.mxu0 %v523_v50 }
 0x1ce   :  { %v929_v54 = vpop.f32.mrf.mxu0 }
 0x1d0   :  { %v930_v56 = vpop.f32.mrf.mxu0 }
 0x1d1   :  { %v931_v57 = vadd.f32 %v930_v56, %v929_v54 }
 0x1d2   :  { %v932_v58 = vpop.f32.mrf.mxu0 }
 0x1d3   :  { %v695_v59 = vadd.f32 %v931_v57, %v887_v55 }
 0x1d4   :  { %v933_v60 = vpop.f32.mrf.mxu0 }
 0x1d5   :  { %v700_v61 = vmax.f32 %v695_v59, 0.0 }
 0x1d7   :  { %v701_v62 = vpack.c.bf16 %v700_v61, %v700_v61 }
 0x1d9   :  { %961 = vmatmul.mubr.bf16.vlgmr.msra.gmra.mxu1 %v701_v62 }
 0x299   :  { %v807_v0 = vpop.f32.mrf.mxu1 }
 0x29a   :  { %v808_v1 = vadd.f32 %v904_v63, %v807_v0 }
 0x29b   :  { %v962_v2 = vpop.f32.mrf.mxu1 }
 0x29c   :  { %814 = vst.msk [vmem:[%s1421_s7] sm:$0xff] %vm813_vm1, %v808_v1 }
 0x29d   :  { %v810_v3 = vpop.f32.mrf.mxu1 }
 0x29f   :  { %v963_v4 = vpop.f32.mrf.mxu1 }

</bundles_post_ra>
